<compile_context>
chip_gen: v7x
topology: tpu7x:2x2x1
jax: 0.10.0
libtpu: 0.0.40
codegen_flags: <defaults>
</compile_context>

<pallas_src>
import math

import jax
import jax.numpy as jnp
from jax.experimental import pallas as pl
from jax.experimental.pallas import tpu as pltpu


def _round_up(v, mult):
    return ((v + mult - 1) // mult) * mult


def _num_tensorcores():
    """Best-effort TensorCore count (v7x=2, v5e/v6e=1). Defaults to 1 (safe)."""
    try:
        info = pltpu.get_tpu_info()
    except Exception:
        return 1
    for name in ("num_cores", "core_count", "num_tensorcores",
                 "tensorcore_count", "cores_per_chip"):
        v = getattr(info, name, None)
        if isinstance(v, int) and v > 0:
            return v
    return 1


def _sigmoid_via_tanh(z):
    # sigmoid(z) = 0.5*(tanh(z/2) + 1): one EUP tanh, no f32 divide/reciprocal.
    return 0.5 * jnp.tanh(0.5 * z) + 0.5


def _mylstm_kernel(z_ref, w_ref, b_ref, o_ref):
    # z_ref: (TR, Kp)      packed [x | m] rows, bf16
    # w_ref: (Kp, 4*Hp)    block-placed [W1x^T | W4x^T | W11m^T | W44m^T], bf16
    # b_ref: (1, 4*Hp)     fused bias row [b1 | b4 | b11 | b44], f32
    # o_ref: (TR, Hp)      f32
    hp = o_ref.shape[-1]
    # Single wide matmul on the MXU, f32 accumulate; bias via one broadcast add.
    pre = jnp.dot(z_ref[...], w_ref[...],
                  preferred_element_type=jnp.float32) + b_ref[...]
    # Slices land exactly on 128-lane block boundaries (Hp is a multiple of 128).
    i_g = _sigmoid_via_tanh(pre[:, 0 * hp:1 * hp])
    u_g = jnp.tanh(pre[:, 1 * hp:2 * hp])
    ii_g = _sigmoid_via_tanh(pre[:, 2 * hp:3 * hp])
    uu_g = jnp.tanh(pre[:, 3 * hp:4 * hp])
    # Ct_x = i*u + ii*uu + f*Ct_x  with Ct_x == 0 -> the f gate drops out.
    o_ref[...] = (i_g * u_g + ii_g * uu_g).astype(o_ref.dtype)


def prepare_mylstm_params(params, operand_dtype=jnp.bfloat16):
    """One-time weight packing (hoisted out of the forward path).

    Builds a single block-placed weight operand and a fused bias row:
      w_packed[0:I,   0*Hp:0*Hp+H] = W1[:, H:]^T   (i  gate, from x)
      w_packed[0:I,   1*Hp:1*Hp+H] = W4[:, H:]^T   (u  gate, from x)
      w_packed[I:I+G, 2*Hp:2*Hp+H] = W11[:, H:]^T  (ii gate, from m)
      w_packed[I:I+G, 3*Hp:3*Hp+H] = W44[:, H:]^T  (uu gate, from m)
    """
    H = params["b1"].shape[0]
    I = params["w1"].shape[1] - H
    G = params["w11"].shape[1] - H

    # TODO(synk): for large, already-128-aligned I and G, split back into two
    # input streams / two fused matmuls to avoid block-diagonal zero FLOPs.
    Kp = _round_up(I + G, 128)
    Hp = _round_up(H, 128)

    w = jnp.zeros((Kp, 4 * Hp), jnp.float32)
    w = w.at[0:I, 0 * Hp:0 * Hp + H].set(params["w1"][:, H:].T.astype(jnp.float32))
    w = w.at[0:I, 1 * Hp:1 * Hp + H].set(params["w4"][:, H:].T.astype(jnp.float32))
    w = w.at[I:I + G, 2 * Hp:2 * Hp + H].set(params["w11"][:, H:].T.astype(jnp.float32))
    w = w.at[I:I + G, 3 * Hp:3 * Hp + H].set(params["w44"][:, H:].T.astype(jnp.float32))

    b = jnp.zeros((1, 4 * Hp), jnp.float32)
    b = b.at[0, 0 * Hp:0 * Hp + H].set(params["b1"].astype(jnp.float32))
    b = b.at[0, 1 * Hp:1 * Hp + H].set(params["b4"].astype(jnp.float32))
    b = b.at[0, 2 * Hp:2 * Hp + H].set(params["b11"].astype(jnp.float32))
    b = b.at[0, 3 * Hp:3 * Hp + H].set(params["b44"].astype(jnp.float32))

    return {
        "w_packed": w.astype(operand_dtype),   # bf16 MXU operand
        "b_row": b,                            # bias stays f32
        "input_sz": I, "g_sz": G, "hidden_sz": H,
        "Kp": Kp, "Hp": Hp,
        "operand_dtype": operand_dtype,
    }


def my_lstm_forward(x, m, prepped):
    """x: (B, T, input_sz); m: (B, T, g_sz); prepped: prepare_mylstm_params(...)."""
    B, T, I = x.shape
    G = m.shape[-1]
    assert I == prepped["input_sz"] and G == prepped["g_sz"]
    H = prepped["hidden_sz"]
    Kp, Hp = prepped["Kp"], prepped["Hp"]
    op_dtype = prepped["operand_dtype"]
    in_b = jnp.dtype(op_dtype).itemsize

    R = B * T

    # Row tile: as large as possible (amortizes the ~0.35 us/step overhead and
    # gives big unmasked DMAs), multiple of 16 (bf16 sublane packing), kept
    # under a VMEM budget for the double-buffered in/out blocks.
    TR = min(1024, _round_up(R, 16))
    budget = 24 << 20
    while TR > 16 and 2 * TR * (Kp * in_b + Hp * 4) > budget:
        TR = max(16, _round_up(TR // 2, 16))

    # Multi-TensorCore chips (v7x): aim for >= 2 grid steps per core once there
    # is enough work.  Single-core chips (v5e/v6e): never force a split.
    n_cores = _num_tensorcores()
    if n_cores > 1 and R >= 16 * 2 * n_cores:
        TR = min(TR, max(16, _round_up(-(-R // (2 * n_cores)), 16)))

    Rp = _round_up(R, TR)
    n_steps = Rp // TR

    # One packed, lane-dense input stream: z = [x | m] padded to (Rp, Kp), bf16.
    z = jnp.concatenate(
        [x.reshape(R, I).astype(jnp.float32), m.reshape(R, G).astype(jnp.float32)],
        axis=-1)
    z = jnp.pad(z, ((0, Rp - R), (0, Kp - (I + G)))).astype(op_dtype)

    w = prepped["w_packed"]
    b = prepped["b_row"]

    flops = 2 * Rp * Kp * 4 * Hp
    bytes_accessed = (Rp * Kp * in_b + Kp * 4 * Hp * in_b + 4 * Hp * 4
                      + Rp * Hp * 4)

    # VMEM budget derived from actual buffer math (clamped to v7x's 64 MiB).
    # TODO(synk): on v7x with large I/G/H, pipeline_mode=pl.Buffered(1) on the
    # constant-index-map weight BlockSpec would halve weight residency.
    vmem_needed = (2 * TR * Kp * in_b            # input double-buffer
                   + 2 * TR * Hp * 4             # output double-buffer
                   + 2 * Kp * 4 * Hp * in_b      # resident weights (worst case 2x)
                   + 2 * 8 * 4 * Hp * 4          # bias row (sublane-padded)
                   + 3 * TR * 4 * Hp * 4)        # f32 pre-activation / gate temps
    vmem_limit = max(32 << 20, min(64 << 20, int(1.5 * vmem_needed) + (4 << 20)))

    out = pl.pallas_call(
        _mylstm_kernel,
        out_shape=jax.ShapeDtypeStruct((Rp, Hp), jnp.float32),
        grid_spec=pltpu.PrefetchScalarGridSpec(
            num_scalar_prefetch=0,
            grid=(n_steps,),
            in_specs=[
                pl.BlockSpec((TR, Kp), lambda r: (r, 0)),
                # Constant index maps -> weights / bias stay resident across steps.
                pl.BlockSpec((Kp, 4 * Hp), lambda r: (0, 0)),
                pl.BlockSpec((1, 4 * Hp), lambda r: (0, 0)),
            ],
            out_specs=pl.BlockSpec((TR, Hp), lambda r: (r, 0)),
        ),
        compiler_params=pltpu.CompilerParams(
            dimension_semantics=("parallel",),
            vmem_limit_bytes=vmem_limit),
        cost_estimate=pl.CostEstimate(
            flops=flops,
            transcendentals=4 * Rp * Hp,
            bytes_accessed=bytes_accessed),
    )(z, w, b)

    return out[:R, :H].reshape(B, T, H)


def _reference(x, m, params):
    """Pure-JAX mirror of the PyTorch forward (ht/Ct re-zeroed every timestep)."""
    B, T, _ = x.shape
    H = params["b1"].shape[0]
    z = jnp.zeros((B, T, H), jnp.float32)
    lin = lambda v, w, b: v @ w.T + b
    hx = jnp.concatenate([z, x], axis=-1)
    hm = jnp.concatenate([z, m], axis=-1)
    hxm = jnp.concatenate([z, x, m], axis=-1)
    i = jax.nn.sigmoid(lin(hx, params["w1"], params["b1"]))
    f = jax.nn.sigmoid(lin(hxm, params["w3"], params["b3"]))   # f * 0 drops out
    u = jnp.tanh(lin(hx, params["w4"], params["b4"]))
    ii = jax.nn.sigmoid(lin(hm, params["w11"], params["b11"]))
    uu = jnp.tanh(lin(hm, params["w44"], params["b44"]))
    return i * u + ii * uu + f * z


if __name__ == "__main__":
    B, T = 2, 8
    input_sz, hidden_sz, g_sz = 32, 32, 16

    key = jax.random.PRNGKey(0)
    keys = jax.random.split(key, 14)
    stdv = 1.0 / math.sqrt(hidden_sz)

    def U(k, shape):
        return jax.random.uniform(k, shape, jnp.float32, -stdv, stdv)

    params = {
        "w1": U(keys[0], (hidden_sz, hidden_sz + input_sz)),
        "b1": U(keys[1], (hidden_sz,)),
        "w2": U(keys[2], (hidden_sz, hidden_sz + input_sz + g_sz)),
        "b2": U(keys[3], (hidden_sz,)),
        "w3": U(keys[4], (hidden_sz, hidden_sz + input_sz + g_sz)),
        "b3": U(keys[5], (hidden_sz,)),
        "w4": U(keys[6], (hidden_sz, hidden_sz + input_sz)),
        "b4": U(keys[7], (hidden_sz,)),
        "w11": U(keys[8], (hidden_sz, hidden_sz + g_sz)),
        "b11": U(keys[9], (hidden_sz,)),
        "w44": U(keys[10], (hidden_sz, hidden_sz + g_sz)),
        "b44": U(keys[11], (hidden_sz,)),
    }
    x = jax.random.normal(keys[12], (B, T, input_sz), jnp.float32)
    m = jax.random.normal(keys[13], (B, T, g_sz), jnp.float32)

    prepped = prepare_mylstm_params(params)           # one-time weight packing
    out = jax.block_until_ready(my_lstm_forward(x, m, prepped))

    # Tight check: kernel vs a reference fed the SAME bf16-quantized MXU
    # operands (isolates kernel math from the deliberate bf16 operand cast).
    q = lambda a: a.astype(jnp.bfloat16).astype(jnp.float32)
    params_q = dict(params)
    for k in ("w1", "w4", "w11", "w44"):
        params_q[k] = q(params[k])
    ref_tight = _reference(q(x), q(m), params_q)
    # Envelope check vs the full-f32 reference (bf16 operand-quantization error).
    ref_f32 = _reference(x, m, params)

    ok = (out.shape == (B, T, hidden_sz)
          and bool(jnp.allclose(out, ref_tight, atol=2e-4, rtol=2e-4))
          and bool(jnp.allclose(out, ref_f32, atol=2e-2, rtol=2e-2)))
    if ok:
        print("KERNEL_OK")
    else:
        print("MISMATCH",
              float(jnp.max(jnp.abs(out - ref_tight))),
              float(jnp.max(jnp.abs(out - ref_f32))))
</pallas_src>

<mosaic_0001>
module attributes {stable_mosaic.version = 11 : i64} {
  func.func @_mylstm_kernel(%arg0: i32, %arg1: memref<16x128xbf16, #tpu.memory_space<vmem>>, %arg2: memref<128x512xbf16, #tpu.memory_space<vmem>>, %arg3: memref<1x512xf32, #tpu.memory_space<vmem>>, %arg4: memref<16x128xf32, #tpu.memory_space<vmem>>) attributes {dimension_semantics = [#tpu.dimension_semantics<parallel>], iteration_bounds = array<i64: 1>, scalar_prefetch = 0 : i64, scratch_operands = 0 : i64, tpu.core_type = #tpu.core_type<tc>, window_params = [{transform_indices = @transform_0, window_bounds = array<i64: 16, 128>}, {pipeline_mode = #tpu.pipeline_mode<synchronous>, transform_indices = @transform_1, window_bounds = array<i64: 128, 512>}, {pipeline_mode = #tpu.pipeline_mode<synchronous>, transform_indices = @transform_2, window_bounds = array<i64: 1, 512>}, {transform_indices = @transform_3, window_bounds = array<i64: 16, 128>}]} {
    %c0 = arith.constant 0 : index
    %c0_0 = arith.constant 0 : index
    %0 = vector.load %arg1[%c0, %c0_0] : memref<16x128xbf16, #tpu.memory_space<vmem>>, vector<16x128xbf16>
    %c0_1 = arith.constant 0 : index
    %c0_2 = arith.constant 0 : index
    %1 = vector.load %arg2[%c0_1, %c0_2] : memref<128x512xbf16, #tpu.memory_space<vmem>>, vector<128x512xbf16>
    %cst = arith.constant dense<0.000000e+00> : vector<16x512xf32>
    %2 = tpu.matmul %0, %1, %cst {dimension_numbers = #tpu.dot_dimension_numbers<[1], [0], [0], [1], [0, 0, 1, 1], [], []>} : vector<16x128xbf16>, vector<128x512xbf16>, vector<16x512xf32> -> vector<16x512xf32>
    %c0_3 = arith.constant 0 : index
    %c0_4 = arith.constant 0 : index
    %3 = vector.load %arg3[%c0_3, %c0_4] : memref<1x512xf32, #tpu.memory_space<vmem>>, vector<1x512xf32>
    %4 = vector.broadcast %3 : vector<1x512xf32> to vector<16x512xf32>
    %5 = arith.addf %2, %4 : vector<16x512xf32>
    %6 = vector.extract_strided_slice %5 {offsets = [0, 0], sizes = [16, 128], strides = [1, 1]} : vector<16x512xf32> to vector<16x128xf32>
    %cst_5 = arith.constant 5.000000e-01 : f32
    %7 = vector.broadcast %cst_5 : f32 to vector<16x128xf32>
    %8 = arith.mulf %7, %6 : vector<16x128xf32>
    %9 = math.tanh %8 : vector<16x128xf32>
    %cst_6 = arith.constant 5.000000e-01 : f32
    %10 = vector.broadcast %cst_6 : f32 to vector<16x128xf32>
    %11 = arith.mulf %10, %9 : vector<16x128xf32>
    %cst_7 = arith.constant 5.000000e-01 : f32
    %12 = vector.broadcast %cst_7 : f32 to vector<16x128xf32>
    %13 = arith.addf %11, %12 : vector<16x128xf32>
    %14 = vector.extract_strided_slice %5 {offsets = [0, 128], sizes = [16, 128], strides = [1, 1]} : vector<16x512xf32> to vector<16x128xf32>
    %15 = math.tanh %14 : vector<16x128xf32>
    %16 = vector.extract_strided_slice %5 {offsets = [0, 256], sizes = [16, 128], strides = [1, 1]} : vector<16x512xf32> to vector<16x128xf32>
    %cst_8 = arith.constant 5.000000e-01 : f32
    %17 = vector.broadcast %cst_8 : f32 to vector<16x128xf32>
    %18 = arith.mulf %17, %16 : vector<16x128xf32>
    %19 = math.tanh %18 : vector<16x128xf32>
    %cst_9 = arith.constant 5.000000e-01 : f32
    %20 = vector.broadcast %cst_9 : f32 to vector<16x128xf32>
    %21 = arith.mulf %20, %19 : vector<16x128xf32>
    %cst_10 = arith.constant 5.000000e-01 : f32
    %22 = vector.broadcast %cst_10 : f32 to vector<16x128xf32>
    %23 = arith.addf %21, %22 : vector<16x128xf32>
    %24 = vector.extract_strided_slice %5 {offsets = [0, 384], sizes = [16, 128], strides = [1, 1]} : vector<16x512xf32> to vector<16x128xf32>
    %25 = math.tanh %24 : vector<16x128xf32>
    %26 = arith.mulf %13, %15 : vector<16x128xf32>
    %27 = arith.mulf %23, %25 : vector<16x128xf32>
    %28 = arith.addf %26, %27 : vector<16x128xf32>
    %c0_11 = arith.constant 0 : index
    %c0_12 = arith.constant 0 : index
    %29 = vector.load %arg4[%c0_11, %c0_12] : memref<16x128xf32, #tpu.memory_space<vmem>>, vector<16x128xf32>
    tpu.vector_store %arg4[%c0_11, %c0_12], %28 {strides = array<i32>} : memref<16x128xf32, #tpu.memory_space<vmem>>, vector<16x128xf32>,
    return
  }
  func.func @transform_0(%arg0: i32) -> (i32, i32) {
    %c0_i32 = arith.constant 0 : i32
    %c0_i32_0 = arith.constant 0 : i32
    return %arg0, %c0_i32 : i32, i32
  }
  func.func @transform_1(%arg0: i32) -> (i32, i32) {
    %c0_i32 = arith.constant 0 : i32
    %c0_i32_0 = arith.constant 0 : i32
    %c0_i32_1 = arith.constant 0 : i32
    return %c0_i32, %c0_i32_0 : i32, i32
  }
  func.func @transform_2(%arg0: i32) -> (i32, i32) {
    %c0_i32 = arith.constant 0 : i32
    %c0_i32_0 = arith.constant 0 : i32
    %c0_i32_1 = arith.constant 0 : i32
    return %c0_i32, %c0_i32_0 : i32, i32
  }
  func.func @transform_3(%arg0: i32) -> (i32, i32) {
    %c0_i32 = arith.constant 0 : i32
    %c0_i32_0 = arith.constant 0 : i32
    return %arg0, %c0_i32 : i32, i32
  }
}

</mosaic_0001>

<bundles_post_ra>
// kernel: tpu_custom_call.1
= control target key start
LH: loop header
LB: loop body
LE: loop exit
PB: predicated region body
PF: predicated region fallthrough
CT: control target
= control target key end

     0   :  { %8 = vsyncpa [#allocation3], 0  ;;  %s647_s0 = inlined_call_operand.hbm [shape: bf16[16,128], index: 0, kind: input, shape index: {}]   ;;  %s648_s1 = inlined_call_operand.hbm [shape: bf16[128,512], index: 1, kind: input, shape index: {}]   ;;  %s649_s2 = inlined_call_operand.vmem [shape: f32[1,512], index: 2, kind: input, shape index: {}]   ;;  %s650_s3 = inlined_call_operand.hbm [shape: f32[16,128], index: 3, kind: output, shape index: {}]  }
   0x1   :  { %9 = vsyncpa [#allocation6], 0 }
   0x2   :  { %10 = vsyncpa [#allocation4], 0  ;;  %s578_s12 = smov [#allocation2]   ;;  %s506_s16 = scalar_lea.hbm %s647_s0, 128 }
   0x3   :  { %s16_s13 = sshll.u32 %s578_s12, 4  ;;  %p507_p0 = scmp.ne.s32.totalorder %s647_s0, %s506_s16  ;;  %s17_s13 = int_to_ptr.vmem [resolvable:$true] %s16_s13 }
   0x4   :  { %p510_p1 = scmp.lt.u32.totalorder %s506_s16, %s647_s0 }
   0x6   :  { %p512_p2 = pnand %p510_p1, %p507_p0 }
   0x8   :  { %515 = shalt.err (!%p512_p2)
}
   0x9   :  { %s516_s21 = scalar_lea.vmem %s17_s13, 128  ;;  %p521_p4 = scmp.lt.s32.totalorder %s17_s13, %s17_s13 }
   0xa   :  { %p517_p3 = scmp.ne.s32.totalorder %s17_s13, %s516_s21  ;;  %p522_p5 = scmp.lt.s32.totalorder %s516_s21, %s516_s21 }
   0xc   :  { %p523_p6 = por %p522_p5, %p521_p4 }
   0xe   :  { %p524_p7 = pnand %p523_p6, %p517_p3 }
  0x10   :  { %527 = shalt.err (!%p524_p7)
}
  0x11   :  { %s579_s22 = smov 64   ;;  %s580_s23 = smov 4  }
  0x12   :  { %22 = dma.hbm_to_vmem [thread:$0]  %s647_s0, 128, %s17_s13, [#allocation3], %s579_s22, %s579_s22, %s580_s23  }
  0x13   :  { %s581_s26 = smov [#allocation5]   ;;  %s528_s30 = scalar_lea.hbm %s648_s1, 4096 }
  0x14   :  { %s28_s27 = sshll.u32 %s581_s26, 4  ;;  %p529_p8 = scmp.ne.s32.totalorder %s648_s1, %s528_s30  ;;  %s29_s27 = int_to_ptr.vmem [resolvable:$true] %s28_s27 }
  0x15   :  { %p532_p9 = scmp.lt.u32.totalorder %s528_s30, %s648_s1 }
  0x17   :  { %p534_p10 = pnand %p532_p9, %p529_p8 }
  0x19   :  { %537 = shalt.err (!%p534_p10)
}
  0x1a   :  { %s538_s8 = scalar_lea.vmem %s29_s27, 4096  ;;  %p543_p12 = scmp.lt.s32.totalorder %s29_s27, %s29_s27 }
  0x1b   :  { %p539_p11 = scmp.ne.s32.totalorder %s29_s27, %s538_s8  ;;  %p544_p13 = scmp.lt.s32.totalorder %s538_s8, %s538_s8 }
  0x1d   :  { %p545_p0 = por %p544_p13, %p543_p12 }
  0x1f   :  { %p546_p1 = pnand %p545_p0, %p539_p11 }
  0x21   :  { %549 = shalt.err (!%p546_p1)
}
  0x22   :  { %s582_s0 = smov 256   ;;  %s583_s9 = smov 16  }
  0x23   :  { %34 = dma.hbm_to_vmem [thread:$0]  %s648_s1, 4096, %s29_s27, [#allocation6], %s582_s0, %s582_s0, %s583_s9  }
  0x24   :  { %572 = dma.done.wait [#allocation3], 128  }
  0x25   :  { %573 = vsyncadd [#allocation3], 4294967168 }
  0x26   :  { %574 = dma.done.wait [#allocation6], 4096  }
  0x27   :  { %575 = vsyncadd [#allocation6], 4294963200  ;;  %v584_v0 = vmov 0   ;;  %v441_v1 = vld [vmem:[#allocation5 + $0x4] ss:$16 sps:$4 sm:$0xff]   ;;  %v489_v33 = vld [vmem:[#allocation2] sm:$0xff]   ;;  %v80_v34 = vlaneseq }
  0x28   :  { %298 = vmatprep.mubr.bf16.mxu0 %v584_v0  ;;  %341 = vmatprep.mubr.bf16.mxu1 %v584_v0  ;;  %v443_v2 = vld [vmem:[#allocation5 + $0xc] ss:$16 sps:$4 sm:$0xff]   ;;  %v445_v3 = vld [vmem:[#allocation5] ss:$16 sps:$4 sm:$0xff]   ;;  %v446_v4 = vld [vmem:[#allocation5 + $0x8] ss:$16 sps:$4 sm:$0xff]  }
  0x29   :  { %266 = vmatprep.subr.bf16.mxu0 %v441_v1  ;;  %309 = vmatprep.subr.bf16.mxu1 %v443_v2  ;;  %v447_v5 = vld [vmem:[#allocation5 + $0x24] ss:$16 sps:$4 sm:$0xff]   ;;  %v449_v6 = vld [vmem:[#allocation5 + $0x2c] ss:$16 sps:$4 sm:$0xff]   ;;  %v451_v7 = vld [vmem:[#allocation5 + $0x20] ss:$16 sps:$4 sm:$0xff]  }
  0x2a   :  { %267 = vmatpush1.bf16.msra.mxu0 %v445_v3  ;;  %310 = vmatpush1.bf16.msra.mxu1 %v446_v4  ;;  %v452_v8 = vld [vmem:[#allocation5 + $0x28] ss:$16 sps:$4 sm:$0xff]   ;;  %v453_v9 = vld [vmem:[#allocation5 + $0x44] ss:$16 sps:$4 sm:$0xff]   ;;  %v455_v10 = vld [vmem:[#allocation5 + $0x4c] ss:$16 sps:$4 sm:$0xff]  }
  0x2b   :  { %268 = vmatprep.subr.bf16.mxu0 %v447_v5  ;;  %311 = vmatprep.subr.bf16.mxu1 %v449_v6  ;;  %v457_v11 = vld [vmem:[#allocation5 + $0x40] ss:$16 sps:$4 sm:$0xff]   ;;  %v458_v12 = vld [vmem:[#allocation5 + $0x48] ss:$16 sps:$4 sm:$0xff]   ;;  %v459_v13 = vld [vmem:[#allocation5 + $0x64] ss:$16 sps:$4 sm:$0xff]  }
  0x2c   :  { %v461_v14 = vld [vmem:[#allocation5 + $0x6c] ss:$16 sps:$4 sm:$0xff]   ;;  %v463_v15 = vld [vmem:[#allocation5 + $0x60] ss:$16 sps:$4 sm:$0xff]   ;;  %v464_v16 = vld [vmem:[#allocation5 + $0x68] ss:$16 sps:$4 sm:$0xff]  }
  0x2d   :  { %v465_v17 = vld [vmem:[#allocation5 + $0x84] ss:$16 sps:$4 sm:$0xff]   ;;  %v467_v18 = vld [vmem:[#allocation5 + $0x8c] ss:$16 sps:$4 sm:$0xff]   ;;  %v469_v19 = vld [vmem:[#allocation5 + $0x80] ss:$16 sps:$4 sm:$0xff]  }
  0x2e   :  { %269 = vmatpush1.bf16.msra.mxu0 %v451_v7  ;;  %312 = vmatpush1.bf16.msra.mxu1 %v452_v8  ;;  %v470_v20 = vld [vmem:[#allocation5 + $0x88] ss:$16 sps:$4 sm:$0xff]   ;;  %v471_v21 = vld [vmem:[#allocation5 + $0xa4] ss:$16 sps:$4 sm:$0xff]   ;;  %v473_v22 = vld [vmem:[#allocation5 + $0xac] ss:$16 sps:$4 sm:$0xff]  }
  0x2f   :  { %270 = vmatprep.subr.bf16.mxu0 %v453_v9  ;;  %313 = vmatprep.subr.bf16.mxu1 %v455_v10  ;;  %v475_v23 = vld [vmem:[#allocation5 + $0xa0] ss:$16 sps:$4 sm:$0xff]   ;;  %v476_v24 = vld [vmem:[#allocation5 + $0xa8] ss:$16 sps:$4 sm:$0xff]   ;;  %v477_v25 = vld [vmem:[#allocation5 + $0xc4] ss:$16 sps:$4 sm:$0xff]  }
  0x30   :  { %v479_v26 = vld [vmem:[#allocation5 + $0xcc] ss:$16 sps:$4 sm:$0xff]   ;;  %v481_v27 = vld [vmem:[#allocation5 + $0xc0] ss:$16 sps:$4 sm:$0xff]   ;;  %v482_v28 = vld [vmem:[#allocation5 + $0xc8] ss:$16 sps:$4 sm:$0xff]  }
  0x31   :  { %v483_v29 = vld [vmem:[#allocation5 + $0xe4] ss:$16 sps:$4 sm:$0xff]   ;;  %v485_v30 = vld [vmem:[#allocation5 + $0xec] ss:$16 sps:$4 sm:$0xff]   ;;  %v487_v31 = vld [vmem:[#allocation5 + $0xe0] ss:$16 sps:$4 sm:$0xff]  }
  0x32   :  { %271 = vmatpush1.bf16.msra.mxu0 %v457_v11  ;;  %314 = vmatpush1.bf16.msra.mxu1 %v458_v12  ;;  %v488_v32 = vld [vmem:[#allocation5 + $0xe8] ss:$16 sps:$4 sm:$0xff]   ;;  %v81_v35 = vshrl.u32 %v80_v34, 7 }
  0x33   :  { %272 = vmatprep.subr.bf16.mxu0 %v459_v13  ;;  %315 = vmatprep.subr.bf16.mxu1 %v461_v14  ;;  %v78_v38 = vld [vmem:[%s649_s2] sm:$0xf]  ;;  %s585_s2 = smov [#allocation7]  }
  0x34   :  { %v82_v36 = vsub.s32 0, %v81_v35  ;;  %v90_v37 = vsub.s32 2, %v81_v35  ;;  %v86_v39 = vsub.s32 1, %v81_v35  ;;  %v94_v43 = vsub.s32 3, %v81_v35  ;;  %s385_s13 = sshll.u32 %s585_s2, 4  ;;  %s386_s13 = int_to_ptr.vmem [resolvable:$true] %s385_s13 }
  0x35   :  { %s550_s14 = scalar_lea.vmem %s386_s13, 256  ;;  %p555_p3 = scmp.lt.s32.totalorder %s386_s13, %s386_s13 }
  0x36   :  { %273 = vmatpush1.bf16.msra.mxu0 %v463_v15  ;;  %316 = vmatpush1.bf16.msra.mxu1 %v464_v16  ;;  %v83_v40 = vrot.slane %v78_v38, %v82_v36  ;;  %v91_v41 = vrot.slane %v78_v38, %v90_v37  ;;  %v87_v42 = vrot.slane %v78_v38, %v86_v39  ;;  %p551_p2 = scmp.ne.s32.totalorder %s386_s13, %s550_s14  ;;  %p556_p4 = scmp.lt.s32.totalorder %s550_s14, %s550_s14 }
  0x37   :  { %274 = vmatprep.subr.bf16.mxu0 %v465_v17  ;;  %317 = vmatprep.subr.bf16.mxu1 %v467_v18  ;;  %v95_v51 = vrot.slane %v78_v38, %v94_v43 }
  0x38   :  { %p557_p5 = por %p556_p4, %p555_p3 }
  0x3a   :  { %275 = vmatpush1.bf16.msra.mxu0 %v469_v19  ;;  %318 = vmatpush1.bf16.msra.mxu1 %v470_v20  ;;  %p558_p6 = pnand %p557_p5, %p551_p2 }
  0x3b   :  { %276 = vmatprep.subr.bf16.mxu0 %v471_v21  ;;  %319 = vmatprep.subr.bf16.mxu1 %v473_v22 }
  0x3e   :  { %277 = vmatpush1.bf16.msra.mxu0 %v475_v23  ;;  %320 = vmatpush1.bf16.msra.mxu1 %v476_v24 }
  0x3f   :  { %278 = vmatprep.subr.bf16.mxu0 %v477_v25  ;;  %321 = vmatprep.subr.bf16.mxu1 %v479_v26 }
  0x42   :  { %279 = vmatpush1.bf16.msra.mxu0 %v481_v27  ;;  %322 = vmatpush1.bf16.msra.mxu1 %v482_v28 }
  0x43   :  { %280 = vmatprep.subr.bf16.mxu0 %v483_v29  ;;  %323 = vmatprep.subr.bf16.mxu1 %v485_v30 }
  0x46   :  { %281 = vmatpush1.bf16.msra.mxu0 %v487_v31  ;;  %324 = vmatpush1.bf16.msra.mxu1 %v488_v32 }
  0x49   :  { %299 = vmatmul.mubr.bf16.vlgmr.msra.gmra.mrb[0].mxu0 %v489_v33  ;;  %342 = vmatmul.mubr.bf16.vlgmr.msra.gmra.mrb[0].mxu1 %v489_v33 }
 0x11c   :  { %v300_v44 = vpop.f32.mrb[0].mxu0  ;;  %v343_v45 = vpop.f32.mrb[0].mxu1 }
 0x11d   :  { %v301_v46 = vadd.f32 %v300_v44, %v83_v40  ;;  %v344_v47 = vadd.f32 %v343_v45, %v91_v41  ;;  %v302_v48 = vpop.f32.mrb[1].mxu0  ;;  %v345_v49 = vpop.f32.mrb[1].mxu1 }
 0x11e   :  { %v303_v50 = vadd.f32 %v302_v48, %v87_v42  ;;  %v304_v52 = vpop.f32.mrb[2].mxu0  ;;  %v347_v53 = vpop.f32.mrb[2].mxu1  ;;  %v346_v62 = vadd.f32 %v345_v49, %v95_v51 }
 0x11f   :  { %v352_v54 = vmul.f32 0.5, %v301_v46  ;;  %v362_v55 = vmul.f32 0.5, %v344_v47  ;;  %v305_v56 = vadd.f32 %v304_v52, %v83_v40  ;;  %v348_v57 = vadd.f32 %v347_v53, %v91_v41  ;;  %v306_v58 = vpop.f32.mrb[3].mxu0  ;;  %v349_v59 = vpop.f32.mrb[3].mxu1 }
 0x120   :  { %v307_v63 = vadd.f32 %v306_v58, %v87_v42  ;;  %v350_v0 = vadd.f32 %v349_v59, %v95_v51 }
 0x121   :  { %490 = vtanh.f32 %v352_v54  ;;  %v353_v60 = vmul.f32 0.5, %v305_v56  ;;  %v363_v61 = vmul.f32 0.5, %v348_v57 }
 0x122   :  { %492 = vtanh.f32 %v362_v55 }
 0x123   :  { %494 = vtanh.f32 %v303_v50 }
 0x124   :  { %496 = vtanh.f32 %v353_v60 }
 0x125   :  { %498 = vtanh.f32 %v363_v61 }
 0x126   :  { %500 = vtanh.f32 %v346_v62 }
 0x127   :  { %502 = vtanh.f32 %v307_v63 }
 0x128   :  { %504 = vtanh.f32 %v350_v0 }
 0x12b   :  { %v491_v1 = vpop.eup %490 }
 0x12c   :  { %v493_v2 = vpop.eup %492  ;;  %v356_v3 = vmul.f32 0.5, %v491_v1 }
 0x12d   :  { %v495_v4 = vpop.eup %494  ;;  %v366_v5 = vmul.f32 0.5, %v493_v2 }
 0x12e   :  { %v497_v6 = vpop.eup %496  ;;  %v358_v7 = vadd.f32 0.5, %v356_v3 }
 0x12f   :  { %v499_v8 = vpop.eup %498  ;;  %v368_v9 = vadd.f32 0.5, %v366_v5  ;;  %v357_v10 = vmul.f32 0.5, %v497_v6 }
 0x130   :  { %v501_v11 = vpop.eup %500  ;;  %v372_v12 = vmul.f32 %v495_v4, %v358_v7  ;;  %v367_v13 = vmul.f32 0.5, %v499_v8 }
 0x131   :  { %v374_v14 = vmul.f32 %v501_v11, %v368_v9  ;;  %v359_v15 = vadd.f32 0.5, %v357_v10  ;;  %v503_v16 = vpop.eup %502 }
 0x132   :  { %v369_v17 = vadd.f32 0.5, %v367_v13  ;;  %v505_v18 = vpop.eup %504 }
 0x133   :  { %v373_v19 = vmul.f32 %v503_v16, %v359_v15  ;;  %v376_v20 = vadd.f32 %v374_v14, %v372_v12 }
 0x134   :  { %v375_v21 = vmul.f32 %v505_v18, %v369_v17 }
 0x135   :  { %378 = vst [vmem:[#allocation7] sm:$0xff] %v376_v20 }
 0x136   :  { %v377_v22 = vadd.f32 %v375_v21, %v373_v19 }
 0x138   :  { %379 = vst [vmem:[#allocation7 + $0x8] sm:$0xff] %v377_v22 }
 0x139   :  { %561 = shalt.err (!%p558_p6)
}
 0x13a   :  { %s562_s17 = scalar_lea.hbm %s650_s3, 256 }
 0x13b   :  { %p563_p7 = scmp.ne.s32.totalorder %s650_s3, %s562_s17  ;;  %p566_p8 = scmp.lt.u32.totalorder %s562_s17, %s650_s3 }
 0x13d   :  { %p568_p9 = pnand %p566_p8, %p563_p7 }
 0x13f   :  { %571 = shalt.err (!%p568_p9)
}
 0x140   :  { %s586_s22 = smov 128   ;;  %s587_s23 = smov 8  }
 0x141   :  { %391 = dma.vmem_to_hbm [thread:$0]  %s386_s13, 256, %s650_s3, [#allocation4], %s586_s22, %s586_s22, %s587_s23  }
 0x142   :  { %576 = dma.done.wait [#allocation4], 256  }
 0x143   :  { %577 = vsyncadd [#allocation4], 4294967040 }
 0x144   :  { %395 = vsyncpa [#allocation3], 1 }
 0x145   :  { %396 = vsyncpa [#allocation6], 1 }
 0x146   :  { %397 = vsyncpa [#allocation4], 1 }

</bundles_post_ra>
